<compile_context>
chip_gen: v7x
topology: tpu7x:2x2x1
jax: 0.10.0
libtpu: 0.0.40
codegen_flags: <defaults>
</compile_context>

<pallas_src>
import jax
import jax.numpy as jnp
from jax import lax
from jax.experimental import pallas as pl
from jax.experimental.pallas import tpu as pltpu


def _attn_kernel(x_ref, w_ref, o_ref):
    # One grid step processes `bb` batch elements; batch*T is folded into the
    # matmul M dimension for the projections (bigger MXU ops, fewer of them).
    bb, t, c = x_ref.shape
    h = w_ref.shape[2]

    x2d = x_ref[...].reshape(bb * t, c)                        # (bb*T, C)

    # Q/K/V projections. Weights arrive stacked as (3, C, H): indexing the
    # leading (non-minor) axis of the ref is free, unlike slicing a fused
    # (bb*T, 3H) matmul result at non-128 lane offsets (0:16, 16:32, 32:48),
    # which would lower to lane-shift relayouts. 1/sqrt(H) is pre-folded into
    # the Q weight by the wrapper, so there is no per-element scale here.
    q = jnp.dot(x2d, w_ref[0], preferred_element_type=jnp.float32)
    k = jnp.dot(x2d, w_ref[1], preferred_element_type=jnp.float32)
    v = jnp.dot(x2d, w_ref[2], preferred_element_type=jnp.float32)
    q = q.reshape(bb, t, h)                                    # (bb, T, H)
    k = k.reshape(bb, t, h)
    v = v.reshape(bb, t, h)

    # Scores: contract the head dim of q and k directly (batch dim 0) — no
    # explicit k.T is materialized in front of the MXU. (At larger T/H,
    # confirm with pl.lower_as_mlir that Mosaic does not insert an XLU
    # transpose for the rhs-minor contraction; invisible at T=8.)
    s = lax.dot_general(
        q, k,
        dimension_numbers=(((2,), (2,)), ((0,), (0,))),
        preferred_element_type=jnp.float32)                    # (bb, T, T)

    # Causal mask (== masked_fill(tril == 0, -inf)), built once as (T, T)
    # and broadcast over the batch dim — no per-batch int32 iotas/compares.
    # A large finite negative underflows to 0 in exp(): numerically identical
    # for causal masks (the diagonal is always unmasked) and NaN-safe.
    row = lax.broadcasted_iota(jnp.int32, (t, t), 0)
    col = lax.broadcasted_iota(jnp.int32, (t, t), 1)
    s = jnp.where((col <= row)[None, :, :], s, jnp.float32(-1e30))

    # Softmax over keys. Exact normalization: at bb*T rows the divide cost is
    # negligible (EUP/VALU far from saturation), and it keeps full f32
    # accuracy (no approx reciprocal, no loosened test tolerance).
    m = jnp.max(s, axis=-1, keepdims=True)
    e = jnp.exp(s - m)
    p = e / jnp.sum(e, axis=-1, keepdims=True)

    # Attention output: (bb, T, T) @ (bb, T, H) -> (bb, T, H).
    out = lax.dot_general(
        p, v,
        dimension_numbers=(((2,), (1,)), ((0,), (0,))),
        preferred_element_type=jnp.float32)

    # TODO(synk): with H=16 the output store has a 16-lane last dim (masked
    # partial-lane vst). The lane-dense fix — presenting the output as a
    # (bb, T*H)=128-lane slab — requires a (T, H)->(T*H) minor-dims vreg
    # relayout that Mosaic's shape_cast does not reliably support for H < 128;
    # the robust fix is the multi-head variant, where packing heads makes the
    # output last dim a multiple of 128 with no in-kernel reshuffle.
    o_ref[...] = out.astype(o_ref.dtype)


def prepare_qkv_weights(wq, wk, wv):
    """Weight prep, done once and hoisted out of the per-call path.

    Stacks the three (C, H) projection matrices into a single (3, C, H)
    operand (leading-axis split is free inside the kernel) and folds the
    1/sqrt(H) attention scale into the Q columns so the kernel does not spend
    a (B, T, H) multiply on it at runtime.
    """
    h = wq.shape[1]
    scale = float(h) ** -0.5
    return jnp.stack([wq * scale, wk, wv], axis=0)             # (3, C, H)


def self_attention(x, wqkv, *, batch_block=None, vmem_limit_bytes=None):
    """x: (B, T, C); wqkv: (3, C, H) from prepare_qkv_weights  ->  (B, T, H).

    batch_block: batches per grid step. Default: all of them on 1-TensorCore
    chips (v5e/v6e — a single grid step avoids the ~0.35us/step pipeline
    overhead at tiny shapes); B//2 on v7x so the 'parallel' batch axis has 2
    steps and both TensorCores are used.
    """
    b, t, c = x.shape
    assert wqkv.shape[0] == 3 and wqkv.shape[1] == c
    h = wqkv.shape[2]

    if batch_block is None:
        batch_block = b
        try:
            kind = jax.devices()[0].device_kind.lower()
            if ("v7" in kind or "7x" in kind) and b >= 2 and b % 2 == 0:
                batch_block = b // 2          # 2 TensorCores per chip on v7x
        except Exception:                     # device query is best-effort
            pass
    assert b % batch_block == 0, "batch_block must divide the batch size"

    bytes_per = jnp.dtype(x.dtype).itemsize
    cost = pl.CostEstimate(
        flops=2 * b * t * c * (3 * h) + 4 * b * t * t * h,
        transcendentals=b * t * t,
        bytes_accessed=(x.size + wqkv.size + b * t * h) * bytes_per,
    )

    compiler_kwargs = dict(dimension_semantics=("parallel",))
    if vmem_limit_bytes is not None:
        # Only needed once T grows (monolithic (T, T) scores): scoped VMEM
        # defaults are 16 MiB (v5e) / 32 MiB (v6e, v7x) vs 128/128/64 physical.
        compiler_kwargs["vmem_limit_bytes"] = vmem_limit_bytes

    # TODO(synk): for non-toy sequence lengths, replace the monolithic (T, T)
    # scores/softmax with a KV-tiled online-softmax (flash) structure (extra
    # trailing 'arbitrary' grid axis, VMEM m/l/acc accumulators with pl.when
    # init/finalize, Wqkv index_map kept constant so it stays resident) and
    # cast x/Wqkv/p to bfloat16 with f32 accumulation for MXU throughput on
    # v6e/v7x. At these shapes everything is latency-bound, so the monolithic
    # f32 single-step form is fastest.
    return pl.pallas_call(
        _attn_kernel,
        out_shape=jax.ShapeDtypeStruct((b, t, h), x.dtype),
        grid_spec=pltpu.PrefetchScalarGridSpec(
            num_scalar_prefetch=0,
            grid=(b // batch_block,),
            in_specs=[
                pl.BlockSpec((batch_block, t, c), lambda i: (i, 0, 0)),  # x tile
                pl.BlockSpec((3, c, h), lambda i: (0, 0, 0)),            # Wqkv (resident)
            ],
            out_specs=pl.BlockSpec((batch_block, t, h), lambda i: (i, 0, 0)),
        ),
        compiler_params=pltpu.CompilerParams(**compiler_kwargs),
        cost_estimate=cost,
    )(x, wqkv)


def _reference(x, wq, wk, wv):
    # Ground truth in full f32 (HIGHEST precision so the XLA reference is not
    # itself degraded to bf16 MXU passes).
    hp = lax.Precision.HIGHEST
    h = wq.shape[1]
    q = jnp.einsum("btc,ch->bth", x, wq, precision=hp)
    k = jnp.einsum("btc,ch->bth", x, wk, precision=hp)
    v = jnp.einsum("btc,ch->bth", x, wv, precision=hp)
    s = jnp.einsum("bqh,bkh->bqk", q, k, precision=hp) * (h ** -0.5)
    t = x.shape[1]
    mask = jnp.tril(jnp.ones((t, t), dtype=bool))
    s = jnp.where(mask, s, -jnp.inf)
    p = jax.nn.softmax(s, axis=-1)
    return jnp.einsum("bqk,bkh->bqh", p, v, precision=hp)


if __name__ == "__main__":
    # Small shapes consistent with the module: emb_dim=32, head_dim=16, block_size=8.
    B, T, C, H = 2, 8, 32, 16

    key = jax.random.PRNGKey(0)
    kx, kq, kk, kv = jax.random.split(key, 4)

    x = jax.random.normal(kx, (B, T, C), dtype=jnp.float32)

    # Deterministic init mimicking nn.Linear(emb_dim, head_dim, bias=False):
    # uniform(-1/sqrt(C), 1/sqrt(C)), stored transposed as (C, H).
    bound = 1.0 / (C ** 0.5)
    wq = jax.random.uniform(kq, (C, H), jnp.float32, -bound, bound)
    wk = jax.random.uniform(kk, (C, H), jnp.float32, -bound, bound)
    wv = jax.random.uniform(kv, (C, H), jnp.float32, -bound, bound)

    # Weight prep (stack + scale fold) happens once, outside the call path.
    wqkv = prepare_qkv_weights(wq, wk, wv)

    out = self_attention(x, wqkv)
    out = jax.block_until_ready(out)

    ref = _reference(x, wq, wk, wv)
    assert out.shape == (B, T, H)
    # Softmax normalization is exact now (no approx reciprocal), so the
    # tolerance is ~20x tighter than before; residual diff is MXU f32
    # pass / accumulation-order noise between the kernel and the reference.
    assert jnp.allclose(out, ref, atol=5e-4, rtol=5e-4), "mismatch vs reference"

    print("KERNEL_OK")
</pallas_src>

<mosaic_0001>
module attributes {stable_mosaic.version = 11 : i64} {
  func.func @_attn_kernel(%arg0: i32, %arg1: memref<2x8x32xf32, #tpu.memory_space<vmem>>, %arg2: memref<3x32x16xf32, #tpu.memory_space<vmem>>, %arg3: memref<2x8x16xf32, #tpu.memory_space<vmem>>) attributes {dimension_semantics = [#tpu.dimension_semantics<parallel>], iteration_bounds = array<i64: 1>, scalar_prefetch = 0 : i64, scratch_operands = 0 : i64, tpu.core_type = #tpu.core_type<tc>, window_params = [{transform_indices = @transform_0, window_bounds = array<i64: 2, 8, 32>}, {pipeline_mode = #tpu.pipeline_mode<synchronous>, transform_indices = @transform_1, window_bounds = array<i64: 3, 32, 16>}, {transform_indices = @transform_2, window_bounds = array<i64: 2, 8, 16>}]} {
    %c0 = arith.constant 0 : index
    %c0_0 = arith.constant 0 : index
    %c0_1 = arith.constant 0 : index
    %0 = vector.load %arg1[%c0, %c0_0, %c0_1] : memref<2x8x32xf32, #tpu.memory_space<vmem>>, vector<2x8x32xf32>
    %1 = vector.shape_cast %0 : vector<2x8x32xf32> to vector<16x32xf32>
    %c0_2 = arith.constant 0 : index
    %c0_3 = arith.constant 0 : index
    %c0_4 = arith.constant 0 : index
    %2 = vector.load %arg2[%c0_2, %c0_3, %c0_4] : memref<3x32x16xf32, #tpu.memory_space<vmem>>, vector<1x32x16xf32>
    %3 = vector.shape_cast %2 : vector<1x32x16xf32> to vector<32x16xf32>
    %cst = arith.constant dense<0.000000e+00> : vector<16x16xf32>
    %4 = tpu.matmul %1, %3, %cst {dimension_numbers = #tpu.dot_dimension_numbers<[1], [0], [0], [1], [0, 0, 1, 1], [], []>} : vector<16x32xf32>, vector<32x16xf32>, vector<16x16xf32> -> vector<16x16xf32>
    %c1 = arith.constant 1 : index
    %c0_5 = arith.constant 0 : index
    %c0_6 = arith.constant 0 : index
    %5 = vector.load %arg2[%c1, %c0_5, %c0_6] : memref<3x32x16xf32, #tpu.memory_space<vmem>>, vector<1x32x16xf32>
    %6 = vector.shape_cast %5 : vector<1x32x16xf32> to vector<32x16xf32>
    %cst_7 = arith.constant dense<0.000000e+00> : vector<16x16xf32>
    %7 = tpu.matmul %1, %6, %cst_7 {dimension_numbers = #tpu.dot_dimension_numbers<[1], [0], [0], [1], [0, 0, 1, 1], [], []>} : vector<16x32xf32>, vector<32x16xf32>, vector<16x16xf32> -> vector<16x16xf32>
    %c2 = arith.constant 2 : index
    %c0_8 = arith.constant 0 : index
    %c0_9 = arith.constant 0 : index
    %8 = vector.load %arg2[%c2, %c0_8, %c0_9] : memref<3x32x16xf32, #tpu.memory_space<vmem>>, vector<1x32x16xf32>
    %9 = vector.shape_cast %8 : vector<1x32x16xf32> to vector<32x16xf32>
    %cst_10 = arith.constant dense<0.000000e+00> : vector<16x16xf32>
    %10 = tpu.matmul %1, %9, %cst_10 {dimension_numbers = #tpu.dot_dimension_numbers<[1], [0], [0], [1], [0, 0, 1, 1], [], []>} : vector<16x32xf32>, vector<32x16xf32>, vector<16x16xf32> -> vector<16x16xf32>
    %11 = vector.shape_cast %4 : vector<16x16xf32> to vector<2x8x16xf32>
    %12 = vector.shape_cast %7 : vector<16x16xf32> to vector<2x8x16xf32>
    %13 = vector.shape_cast %10 : vector<16x16xf32> to vector<2x8x16xf32>
    %cst_11 = arith.constant dense<0.000000e+00> : vector<2x8x8xf32>
    %14 = tpu.matmul %11, %12, %cst_11 {dimension_numbers = #tpu.dot_dimension_numbers<[2], [2], [1], [1], [0, 0, 0, 1, 1, 1], [0], [0]>} : vector<2x8x16xf32>, vector<2x8x16xf32>, vector<2x8x8xf32> -> vector<2x8x8xf32>
    %15 = tpu.iota {dimensions = array<i32: 0>} : vector<8x8xi32>
    %16 = tpu.iota {dimensions = array<i32: 1>} : vector<8x8xi32>
    %17 = arith.cmpi sle, %16, %15 : vector<8x8xi32>
    %18 = vector.shape_cast %17 : vector<8x8xi1> to vector<1x8x8xi1>
    %cst_12 = arith.constant -1.000000e+30 : f32
    %19 = vector.shape_cast %18 : vector<1x8x8xi1> to vector<1x8x8xi1>
    %20 = vector.broadcast %19 : vector<1x8x8xi1> to vector<2x8x8xi1>
    %21 = vector.broadcast %cst_12 : f32 to vector<2x8x8xf32>
    %22 = arith.select %20, %14, %21 : vector<2x8x8xi1>, vector<2x8x8xf32>
    %cst_13 = arith.constant dense<0xFF800000> : vector<2x8xf32>
    %23 = vector.multi_reduction <maximumf>, %22, %cst_13 [2] : vector<2x8x8xf32> to vector<2x8xf32>
    %24 = vector.shape_cast %23 : vector<2x8xf32> to vector<2x8x1xf32>
    %25 = vector.broadcast %24 : vector<2x8x1xf32> to vector<2x8x8xf32>
    %26 = arith.subf %22, %25 : vector<2x8x8xf32>
    %27 = math.exp %26 : vector<2x8x8xf32>
    %cst_14 = arith.constant dense<0.000000e+00> : vector<2x8xf32>
    %28 = vector.multi_reduction <add>, %27, %cst_14 [2] : vector<2x8x8xf32> to vector<2x8xf32>
    %29 = vector.shape_cast %28 : vector<2x8xf32> to vector<2x8x1xf32>
    %30 = vector.broadcast %29 : vector<2x8x1xf32> to vector<2x8x8xf32>
    %31 = arith.divf %27, %30 : vector<2x8x8xf32>
    %cst_15 = arith.constant dense<0.000000e+00> : vector<2x8x16xf32>
    %32 = tpu.matmul %31, %13, %cst_15 {dimension_numbers = #tpu.dot_dimension_numbers<[2], [1], [1], [2], [0, 0, 0, 1, 1, 2], [0], [0]>} : vector<2x8x8xf32>, vector<2x8x16xf32>, vector<2x8x16xf32> -> vector<2x8x16xf32>
    %c0_16 = arith.constant 0 : index
    %c0_17 = arith.constant 0 : index
    %c0_18 = arith.constant 0 : index
    %33 = vector.load %arg3[%c0_16, %c0_17, %c0_18] : memref<2x8x16xf32, #tpu.memory_space<vmem>>, vector<2x8x16xf32>
    tpu.vector_store %arg3[%c0_16, %c0_17, %c0_18], %32 {strides = array<i32>} : memref<2x8x16xf32, #tpu.memory_space<vmem>>, vector<2x8x16xf32>,
    return
  }
  func.func @transform_0(%arg0: i32) -> (i32, i32, i32) {
    %c0_i32 = arith.constant 0 : i32
    %c0_i32_0 = arith.constant 0 : i32
    %c0_i32_1 = arith.constant 0 : i32
    return %arg0, %c0_i32, %c0_i32_0 : i32, i32, i32
  }
  func.func @transform_1(%arg0: i32) -> (i32, i32, i32) {
    %c0_i32 = arith.constant 0 : i32
    %c0_i32_0 = arith.constant 0 : i32
    %c0_i32_1 = arith.constant 0 : i32
    %c0_i32_2 = arith.constant 0 : i32
    return %c0_i32, %c0_i32_0, %c0_i32_1 : i32, i32, i32
  }
  func.func @transform_2(%arg0: i32) -> (i32, i32, i32) {
    %c0_i32 = arith.constant 0 : i32
    %c0_i32_0 = arith.constant 0 : i32
    %c0_i32_1 = arith.constant 0 : i32
    return %arg0, %c0_i32, %c0_i32_0 : i32, i32, i32
  }
}

</mosaic_0001>

<bundles_post_ra>
// kernel: tpu_custom_call.1
= control target key start
LH: loop header
LB: loop body
LE: loop exit
PB: predicated region body
PF: predicated region fallthrough
CT: control target
= control target key end

     0   :  { %vm18_vm0 = vcmask 261120   ;;  %s865_s0 = inlined_call_operand.vmem [shape: f32[2,8,32], index: 0, kind: input, shape index: {}]   ;;  %s866_s1 = inlined_call_operand.vmem [shape: f32[3,32,16], index: 1, kind: input, shape index: {}]   ;;  %s867_s2 = inlined_call_operand.hbm [shape: f32[2,8,16], index: 2, kind: output, shape index: {}]  }
   0x1   :  { %v611_v0 = vld [vmem:[%s866_s1 + $0x20] sm:$0xff]  ;;  %v612_v1 = vld [vmem:[%s866_s1 + $0x28] sm:$0xff]  ;;  %v613_v5 = vld [vmem:[%s866_s1 + $0x30] sm:$0xff] }
   0x2   :  { %v14_v2 = vld [vmem:[%s866_s1] sm:$0xff]  ;;  %v716_v3 = vpack.c.bf16 %v612_v1, %v611_v0  ;;  %v15_v4 = vld [vmem:[%s866_s1 + $0x8] sm:$0xff]  ;;  %v614_v6 = vld [vmem:[%s866_s1 + $0x38] sm:$0xff] }
   0x3   :  { %v708_v7 = vpack.c.bf16 %v15_v4, %v14_v2  ;;  %v720_v8 = vpack.c.bf16 %v614_v6, %v613_v5  ;;  %v16_v9 = vld [vmem:[%s866_s1 + $0x10] sm:$0xff]  ;;  %v17_v10 = vld [vmem:[%s866_s1 + $0x18] sm:$0xff]  ;;  %v12_v11 = vld [vmem:[%s865_s0] sm:$0xff] }
   0x4   :  { %717 = vmatprep.subr.bf16.mxu1 %v716_v3  ;;  %v712_v12 = vpack.c.bf16 %v17_v10, %v16_v9  ;;  %674 = vmatprep.mubr.msk.f32.mxu1 %vm18_vm0, %v12_v11 }
   0x5   :  { %7 = vsyncpa [#allocation3], 0  ;;  %719 = vmatpush3.bf16.msra.mxu1 %v716_v3  ;;  %709 = vmatprep.subr.bf16.mxu0 %v708_v7  ;;  %v13_v13 = vld [vmem:[%s865_s0 + $0x8] sm:$0xff]  ;;  %v769_v14 = vmov 0.0   ;;  %vm770_vm1 = vmmov 0   ;;  %vm260_vm2 = vcmask 130048   ;;  %v413_v25 = vlaneseq }
   0x6   :  { %711 = vmatpush3.bf16.msra.mxu0 %v708_v7  ;;  %721 = vmatprep.subr.bf16.mxu1 %v720_v8  ;;  %v617_v19 = vld [vmem:[%s866_s1 + $0x40] sm:$0xff]  ;;  %v618_v20 = vld [vmem:[%s866_s1 + $0x48] sm:$0xff]  ;;  %v619_v21 = vld [vmem:[%s866_s1 + $0x50] sm:$0xff]  ;;  %vm422_vm4 = vcmask 64512  }
   0x7   :  { %713 = vmatprep.subr.bf16.mxu0 %v712_v12  ;;  %663 = vmatprep.mubr.msk.f32.mxu0 %vm18_vm0, %v12_v11  ;;  %v724_v22 = vpack.c.bf16 %v618_v20, %v617_v19  ;;  %v620_v23 = vld [vmem:[%s866_s1 + $0x58] sm:$0xff]  ;;  %v414_v26 = vshrl.u32 %v413_v25, 7  ;;  %v416_v27 = vand.u32 127, %v413_v25  ;;  %s771_s1 = smov [#allocation2]  }
   0x8   :  { %v728_v24 = vpack.c.bf16 %v620_v23, %v619_v21  ;;  %s598_s8 = sshll.u32 %s771_s1, 4  ;;  %s599_s8 = int_to_ptr.vmem [resolvable:$true] %s598_s8 }
   0x9   :  { %723 = vmatpush3.bf16.msra.mxu1 %v720_v8  ;;  %vm417_vm3 = vcmp.le.s32.totalorder %v416_v27, %v414_v26  ;;  %s745_s9 = scalar_lea.vmem %s599_s8, 256  ;;  %p750_p1 = scmp.lt.s32.totalorder %s599_s8, %s599_s8 }
   0xa   :  { %715 = vmatpush3.bf16.msra.mxu0 %v712_v12  ;;  %688 = vmatprep.subr.mxu1 %v769_v14  ;;  %p746_p0 = scmp.ne.s32.totalorder %s599_s8, %s745_s9  ;;  %p751_p2 = scmp.lt.s32.totalorder %s745_s9, %s745_s9 }
   0xb   :  { %725 = vmatprep.subr.bf16.mxu0 %v724_v22 }
   0xc   :  { %675 = vmatmul.mubr.msk.f32.vlgmr.msra.gmra.mrb[0].mxu1 %vm18_vm0, %v13_v13  ;;  %p752_p3 = por %p751_p2, %p750_p1 }
   0xd   :  { %664 = vmatmul.mubr.msk.f32.vlgmr.msra.gmra.mrb[0].mxu0 %vm18_vm0, %v13_v13  ;;  %690 = vmatprep.mubr.msk.f32.mxu1 %vm770_vm1, %v769_v14 }
   0xe   :  { %685 = vmatprep.mubr.msk.f32.mxu0 %vm18_vm0, %v12_v11  ;;  %727 = vmatpush3.bf16.msra.mxu0 %v724_v22  ;;  %p753_p4 = pnand %p752_p3, %p746_p0 }
   0xf   :  { %729 = vmatprep.subr.bf16.mxu0 %v728_v24 }
  0x12   :  { %731 = vmatpush3.bf16.msra.mxu0 %v728_v24 }
  0x13   :  { %698 = vmatprep.subr.mxu0 %v769_v14 }
  0x15   :  { %686 = vmatmul.mubr.msk.f32.vlgmr.msra.gmra.mrb[2].mxu0 %vm18_vm0, %v13_v13 }
  0x16   :  { %700 = vmatprep.mubr.msk.f32.mxu0 %vm770_vm1, %v769_v14 }
  0xdf   :  { %v676_v15 = vpop.f32.mrb[0].mxu1 }
  0xe0   :  { %v171_v16 = vpop.f32.mrb[1].mxu1  ;;  %v665_v17 = vpop.f32.mrb[0].mxu0 }
  0xe1   :  { %689 = vmatpush3.xpose.msk.msra.mxu1 %vm260_vm2, %v171_v16  ;;  %v91_v18 = vpop.f32.mrb[1].mxu0 }
  0xe2   :  { %693 = vmatprep.subr.mxu1 %v769_v14 }
  0xe4   :  { %691 = vmatmul.mubr.msk.f32.vlgmr.msra.gmra.mrb[2].mxu1 %vm260_vm2, %v91_v18 }
  0xe5   :  { %694 = vmatpush3.xpose.msk.msra.mxu1 %vm260_vm2, %v676_v15  ;;  %695 = vmatprep.mubr.msk.f32.mxu1 %vm770_vm1, %v769_v14 }
  0xe6   :  { %703 = vmatprep.subr.mxu1 %v769_v14 }
  0xe8   :  { %696 = vmatmul.mubr.msk.f32.vlgmr.msra.gmra.mrb[4].mxu1 %vm260_vm2, %v665_v17  ;;  %v687_v46 = vpop.f32.mrb[2].mxu0 }
  0xe9   :  { %705 = vmatprep.mubr.msk.f32.mxu1 %vm770_vm1, %v769_v14  ;;  %v251_v47 = vpop.f32.mrb[3].mxu0  ;;  %704 = vmatpush3.msra.mxu1 %v687_v46 }
  0xea   :  { %699 = vmatpush3.msra.mxu0 %v251_v47 }
 0x1b7   :  { %v333_v28 = vpop.f32.mrb[2].mxu1 }
 0x1b8   :  { %v420_v29 = vsel %vm417_vm3, %v333_v28, -1e+30  ;;  %v692_v30 = vpop.f32.mrb[3].mxu1 }
 0x1b9   :  { %v423_v31 = vsel %vm422_vm4, %v420_v29, -inf }
 0x1ba   :  { %424 = vmax.xlane.f32.xlu0 %v423_v31 }
 0x1bb   :  { %v409_v32 = vpop.f32.mrb[4].mxu1 }
 0x1bc   :  { %v421_v33 = vsel %vm417_vm3, %v409_v32, -1e+30  ;;  %v697_v34 = vpop.f32.mrb[5].mxu1 }
 0x1bd   :  { %v426_v35 = vsel %vm422_vm4, %v421_v33, -inf }
 0x1be   :  { %427 = vmax.xlane.f32.xlu0 %v426_v35 }
 0x247   :  { %v425_v36 = vpop.xlane.xlu0 %424 }
 0x248   :  { %v429_v37 = vsub.f32 %v420_v29, %v425_v36 }
 0x24a   :  { %v431_v38 = vmul.f32 1.442695, %v429_v37 }
 0x24b   :  { %v428_v39 = vpop.xlane.xlu0 %427 }
 0x24c   :  { %737 = vpow2.f32 %v431_v38  ;;  %v430_v40 = vsub.f32 %v421_v33, %v428_v39 }
 0x24e   :  { %v433_v41 = vmul.f32 1.442695, %v430_v40 }
 0x250   :  { %739 = vpow2.f32 %v433_v41 }
 0x256   :  { %v738_v42 = vpop.eup %737 }
 0x257   :  { %v435_v43 = vsel %vm422_vm4, %v738_v42, 0.0 }
 0x258   :  { %436 = vadd.xlane.f32.xlu1 %v435_v43 }
 0x25a   :  { %v740_v44 = vpop.eup %739 }
 0x25b   :  { %v438_v45 = vsel %vm422_vm4, %v740_v44, 0.0 }
 0x25c   :  { %439 = vadd.xlane.f32.xlu1 %v438_v45 }
 0x2e5   :  { %v437_v48 = vpop.xlane.xlu1 %436 }
 0x2e6   :  { %741 = vrcp.f32 %v437_v48 }
 0x2e9   :  { %v440_v49 = vpop.xlane.xlu1 %439 }
 0x2ea   :  { %743 = vrcp.f32 %v440_v49 }
 0x2f0   :  { %v742_v50 = vpop.eup %741 }
 0x2f1   :  { %v442_v51 = vmul.f32 %v742_v50, %v738_v42 }
 0x2f3   :  { %701 = vmatmul.mubr.msk.f32.vlgmr.msra.gmra.mrb[4].mxu0 %vm422_vm4, %v442_v51 }
 0x2f4   :  { %v744_v52 = vpop.eup %743 }
 0x2f5   :  { %v444_v53 = vmul.f32 %v744_v52, %v740_v44 }
 0x2f7   :  { %706 = vmatmul.mubr.msk.f32.vlgmr.msra.gmra.mrb[6].mxu1 %vm422_vm4, %v444_v53 }
 0x3c6   :  { %v514_v54 = vpop.f32.mrb[4].mxu0 }
 0x3c7   :  { %591 = vst.msk [vmem:[#allocation2] sm:$0xff] %vm260_vm2, %v514_v54  ;;  %v702_v55 = vpop.f32.mrb[5].mxu0 }
 0x3ca   :  { %v587_v56 = vpop.f32.mrb[6].mxu1 }
 0x3cb   :  { %592 = vst.msk [vmem:[#allocation2 + $0x8] sm:$0xff] %vm260_vm2, %v587_v56  ;;  %v707_v57 = vpop.f32.mrb[7].mxu1 }
 0x3cc   :  { %756 = shalt.err (!%p753_p4)
}
 0x3cd   :  { %s757_s12 = scalar_lea.hbm %s867_s2, 256 }
 0x3ce   :  { %p758_p5 = scmp.ne.s32.totalorder %s867_s2, %s757_s12  ;;  %p761_p6 = scmp.lt.u32.totalorder %s757_s12, %s867_s2 }
 0x3d0   :  { %p763_p7 = pnand %p761_p6, %p758_p5 }
 0x3d2   :  { %766 = shalt.err (!%p763_p7)
}
 0x3d3   :  { %s772_s17 = smov 128   ;;  %s773_s18 = smov 8  }
 0x3d4   :  { %604 = dma.vmem_to_hbm [thread:$0]  %s599_s8, 256, %s867_s2, [#allocation3], %s772_s17, %s772_s17, %s773_s18  }
 0x3d5   :  { %767 = dma.done.wait [#allocation3], 256  }
 0x3d6   :  { %768 = vsyncadd [#allocation3], 4294967040 }
 0x3d7   :  { %608 = vsyncpa [#allocation3], 1 }

</bundles_post_ra>
